<compile_context>
chip_gen: v6e
topology: v6e:2x2x1
jax: 0.10.0
libtpu: 0.0.40
codegen_flags: <defaults>
</compile_context>

<pallas_src>
import functools

import jax
import jax.numpy as jnp
from jax.experimental import pallas as pl
from jax.experimental.pallas import tpu as pltpu

N_NEURONS = 128
INPUT_SIZE = 3
OUTPUT_SIZE = 3
IN_PAD = 8          # input features padded 3 -> 8 so layer 1 uses the MXU
N_LAYERS = 7        # linear1..linear6 + output, each followed by SiLU


def _round_up(n, m):
    return ((n + m - 1) // m) * m


def _silu(x):
    # Exact SiLU with one EUP op: sigmoid(x) = 0.5 + 0.5*tanh(0.5*x).
    half = jnp.asarray(0.5, x.dtype)
    return x * (half + half * jnp.tanh(x * half))


def _silu_ref(x):
    return x * jax.nn.sigmoid(x)


def mlp_kernel(x_ref, w1_ref, wstack_ref, bstack_ref, out_ref, *,
               compute_dtype, ew_dtype):
    # x_ref:      (bt, IN_PAD)                  f32 (zero-padded cols 3..7)
    # w1_ref:     (IN_PAD, N_NEURONS)           compute_dtype (padded layer-1 W)
    # wstack_ref: (N_LAYERS-1, N, N)            compute_dtype (layers 2..7, padded)
    # bstack_ref: (N_LAYERS, 1, N)              f32 (all biases, padded)
    # out_ref:    (bt, OUTPUT_SIZE)             f32
    x = x_ref[...].astype(compute_dtype)

    # Layer 1: K=8 matmul on the MXU (MXU has slack; frees VPU/XLU slots).
    acc = jnp.dot(x, w1_ref[...], preferred_element_type=jnp.float32)
    h = _silu(acc.astype(ew_dtype) + bstack_ref[0].astype(ew_dtype))

    # Layers 2..7: dense 128x128 matmuls on the MXU, f32 accumulation,
    # bias-add + SiLU in ew_dtype (bf16 on v6e/v7x, f32 on v5e).
    for layer in range(N_LAYERS - 1):
        acc = jnp.dot(h.astype(compute_dtype), wstack_ref[layer],
                      preferred_element_type=jnp.float32)
        h = _silu(acc.astype(ew_dtype) + bstack_ref[layer + 1].astype(ew_dtype))

    # Only the 3 real output columns are stored (narrow masked vst; ~42x less
    # HBM write than a 128-wide padded store).
    out_ref[...] = h[:, :OUTPUT_SIZE].astype(out_ref.dtype)


def prepare_params(params, use_bf16=True):
    """Pad & stack parameters once (hoisted out of the per-call jit).

    params: list of (W_t, b) with W_t shaped (in_features, out_features)
            (i.e. the torch Linear weight, pre-transposed).
    Returns (w1, wstack, bstack).
    """
    compute_dtype = jnp.bfloat16 if use_bf16 else jnp.float32

    w1_t, b1 = params[0]
    w1 = jnp.zeros((IN_PAD, N_NEURONS), jnp.float32)
    w1 = w1.at[:INPUT_SIZE, :].set(jnp.asarray(w1_t, jnp.float32))
    w1 = w1.astype(compute_dtype)                                       # (8, 128)

    biases = [jnp.zeros((1, N_NEURONS), jnp.float32).at[0, : b1.shape[0]].set(b1)]
    weights = []
    for (w_t, b) in params[1:]:
        w_pad = jnp.zeros((N_NEURONS, N_NEURONS), jnp.float32)
        w_pad = w_pad.at[: w_t.shape[0], : w_t.shape[1]].set(w_t)
        weights.append(w_pad)
        biases.append(
            jnp.zeros((1, N_NEURONS), jnp.float32).at[0, : b.shape[0]].set(b))

    wstack = jnp.stack(weights).astype(compute_dtype)                   # (6, 128, 128)
    bstack = jnp.stack(biases)                                          # (7, 1, 128) f32
    return w1, wstack, bstack


def elementwise_bf16_default():
    """bf16 bias-add/SiLU only where the VPU/EUP support bf16 (v6e, v7x)."""
    try:
        kind = jax.devices()[0].device_kind.lower()
    except Exception:
        return False
    for old in ("v2", "v3", "v4", "v5"):
        if old in kind:
            return False
    return True


@functools.partial(jax.jit, static_argnames=("batch_tile", "ew_bf16"))
def mlp_forward(x, w1, wstack, bstack, batch_tile=2048, ew_bf16=True):
    """x: (B, INPUT_SIZE) float32; (w1, wstack, bstack) from prepare_params()."""
    B = x.shape[0]
    compute_dtype = wstack.dtype
    ew_dtype = (jnp.bfloat16
                if (ew_bf16 and compute_dtype == jnp.bfloat16) else jnp.float32)

    # Tile: large (amortizes ~0.35us/step), 8-aligned, and capped so that
    # n_b >= 2 whenever B > 8 (keeps both v7x TensorCores busy).
    half_b = -(-B // 2)                      # ceil(B / 2)
    bt = min(batch_tile, max(8, _round_up(half_b, 8)))
    B_pad = _round_up(B, bt)

    # Pad rows to a tile multiple and input columns 3 -> 8 (tiny: 32 B/row).
    if B_pad != B or IN_PAD != INPUT_SIZE:
        x = jnp.pad(x, ((0, B_pad - B), (0, IN_PAD - INPUT_SIZE)))
    n_b = B_pad // bt

    kernel = functools.partial(mlp_kernel,
                               compute_dtype=compute_dtype, ew_dtype=ew_dtype)

    out = pl.pallas_call(
        kernel,
        out_shape=jax.ShapeDtypeStruct((B_pad, OUTPUT_SIZE), jnp.float32),
        grid_spec=pltpu.PrefetchScalarGridSpec(
            num_scalar_prefetch=0,
            grid=(n_b,),
            in_specs=[
                pl.BlockSpec((bt, IN_PAD), lambda i: (i, 0)),            # x
                pl.BlockSpec((IN_PAD, N_NEURONS), lambda i: (0, 0)),     # w1
                pl.BlockSpec((N_LAYERS - 1, N_NEURONS, N_NEURONS),
                             lambda i: (0, 0, 0)),                       # wstack
                pl.BlockSpec((N_LAYERS, 1, N_NEURONS),
                             lambda i: (0, 0, 0)),                       # bstack
            ],
            # Narrow output block: only the 3 real columns ever reach HBM.
            out_specs=pl.BlockSpec((bt, OUTPUT_SIZE), lambda i: (i, 0)),
        ),
        compiler_params=pltpu.CompilerParams(
            dimension_semantics=("parallel",),
        ),
    )(x, w1, wstack, bstack)

    if B_pad != B:
        out = out[:B]          # row-only slice on a 3-wide buffer (negligible)
    return out


def init_params(key):
    """Deterministic init matching torch.nn.Linear shapes; weights returned
    pre-transposed as (in_features, out_features)."""
    sizes = ([(INPUT_SIZE, N_NEURONS)]
             + [(N_NEURONS, N_NEURONS)] * 5
             + [(N_NEURONS, OUTPUT_SIZE)])
    params = []
    for (fan_in, fan_out) in sizes:
        key, kw, kb = jax.random.split(key, 3)
        bound = 1.0 / jnp.sqrt(fan_in)
        w_t = jax.random.uniform(kw, (fan_in, fan_out), jnp.float32, -bound, bound)
        b = jax.random.uniform(kb, (fan_out,), jnp.float32, -bound, bound)
        params.append((w_t, b))
    return params


def reference_forward(x, params):
    h = x
    for (w_t, b) in params:
        h = _silu_ref(h @ w_t + b)
    return h


if __name__ == "__main__":
    key = jax.random.PRNGKey(0)
    key, kx, kx2 = jax.random.split(key, 3)
    params = init_params(key)
    ew_bf16 = elementwise_bf16_default()

    # Small, 8-aligned test batch.
    B = 8
    x = jax.random.normal(kx, (B, INPUT_SIZE), dtype=jnp.float32)
    ref = reference_forward(x, params)

    # f32 path: checks exact forward semantics (tanh-based sigmoid is exact).
    w1_f32, ws_f32, bs_f32 = prepare_params(params, use_bf16=False)
    out_f32 = jax.block_until_ready(
        mlp_forward(x, w1_f32, ws_f32, bs_f32, ew_bf16=ew_bf16))
    assert out_f32.shape == (B, OUTPUT_SIZE)
    assert jnp.allclose(out_f32, ref, atol=1e-2, rtol=1e-2), "f32 kernel mismatch"

    # bf16 path (default fast path): looser tolerance vs f32 reference.
    w1_bf, ws_bf, bs_bf = prepare_params(params, use_bf16=True)
    out_bf = jax.block_until_ready(
        mlp_forward(x, w1_bf, ws_bf, bs_bf, ew_bf16=ew_bf16))
    assert out_bf.shape == (B, OUTPUT_SIZE)
    assert jnp.allclose(out_bf, ref, atol=5e-2, rtol=5e-2), "bf16 kernel mismatch"

    # Batch not divisible by 8 / tile: exercises the pad + multi-tile + row-slice
    # path (bt is capped at ceil(B/2) rounded to 8, so n_b == 2 here).
    B2 = 12
    x2 = jax.random.normal(kx2, (B2, INPUT_SIZE), dtype=jnp.float32)
    ref2 = reference_forward(x2, params)
    out2 = jax.block_until_ready(
        mlp_forward(x2, w1_bf, ws_bf, bs_bf, ew_bf16=ew_bf16))
    assert out2.shape == (B2, OUTPUT_SIZE)
    assert jnp.allclose(out2, ref2, atol=5e-2, rtol=5e-2), "ragged-batch mismatch"

    print("KERNEL_OK")
</pallas_src>

<mosaic_0001>
module attributes {stable_mosaic.version = 11 : i64} {
  func.func @mlp_kernel(%arg0: i32, %arg1: memref<8x8xf32, #tpu.memory_space<vmem>>, %arg2: memref<8x128xf32, #tpu.memory_space<vmem>>, %arg3: memref<6x128x128xf32, #tpu.memory_space<vmem>>, %arg4: memref<7x1x128xf32, #tpu.memory_space<vmem>>, %arg5: memref<8x3xf32, #tpu.memory_space<vmem>>) attributes {dimension_semantics = [#tpu.dimension_semantics<parallel>], iteration_bounds = array<i64: 1>, scalar_prefetch = 0 : i64, scratch_operands = 0 : i64, tpu.core_type = #tpu.core_type<tc>, window_params = [{transform_indices = @transform_0, window_bounds = array<i64: 8, 8>}, {pipeline_mode = #tpu.pipeline_mode<synchronous>, transform_indices = @transform_1, window_bounds = array<i64: 8, 128>}, {pipeline_mode = #tpu.pipeline_mode<synchronous>, transform_indices = @transform_2, window_bounds = array<i64: 6, 128, 128>}, {pipeline_mode = #tpu.pipeline_mode<synchronous>, transform_indices = @transform_3, window_bounds = array<i64: 7, 1, 128>}, {transform_indices = @transform_4, window_bounds = array<i64: 8, 3>}]} {
    %c0 = arith.constant 0 : index
    %c0_0 = arith.constant 0 : index
    %0 = vector.load %arg1[%c0, %c0_0] : memref<8x8xf32, #tpu.memory_space<vmem>>, vector<8x8xf32>
    %c0_1 = arith.constant 0 : index
    %c0_2 = arith.constant 0 : index
    %1 = vector.load %arg2[%c0_1, %c0_2] : memref<8x128xf32, #tpu.memory_space<vmem>>, vector<8x128xf32>
    %cst = arith.constant dense<0.000000e+00> : vector<8x128xf32>
    %2 = tpu.matmul %0, %1, %cst {dimension_numbers = #tpu.dot_dimension_numbers<[1], [0], [0], [1], [0, 0, 1, 1], [], []>} : vector<8x8xf32>, vector<8x128xf32>, vector<8x128xf32> -> vector<8x128xf32>
    %c0_3 = arith.constant 0 : index
    %c0_4 = arith.constant 0 : index
    %c0_5 = arith.constant 0 : index
    %3 = vector.load %arg4[%c0_3, %c0_4, %c0_5] : memref<7x1x128xf32, #tpu.memory_space<vmem>>, vector<1x1x128xf32>
    %4 = vector.shape_cast %3 : vector<1x1x128xf32> to vector<1x128xf32>
    %5 = vector.broadcast %4 : vector<1x128xf32> to vector<8x128xf32>
    %6 = arith.addf %2, %5 : vector<8x128xf32>
    %cst_6 = arith.constant 5.000000e-01 : f32
    %7 = vector.broadcast %cst_6 : f32 to vector<8x128xf32>
    %8 = arith.mulf %6, %7 : vector<8x128xf32>
    %9 = math.tanh %8 : vector<8x128xf32>
    %cst_7 = arith.constant 5.000000e-01 : f32
    %10 = vector.broadcast %cst_7 : f32 to vector<8x128xf32>
    %11 = arith.mulf %10, %9 : vector<8x128xf32>
    %cst_8 = arith.constant 5.000000e-01 : f32
    %12 = vector.broadcast %cst_8 : f32 to vector<8x128xf32>
    %13 = arith.addf %12, %11 : vector<8x128xf32>
    %14 = arith.mulf %6, %13 : vector<8x128xf32>
    %c0_9 = arith.constant 0 : index
    %c0_10 = arith.constant 0 : index
    %c0_11 = arith.constant 0 : index
    %15 = vector.load %arg3[%c0_9, %c0_10, %c0_11] : memref<6x128x128xf32, #tpu.memory_space<vmem>>, vector<1x128x128xf32>
    %16 = vector.shape_cast %15 : vector<1x128x128xf32> to vector<128x128xf32>
    %cst_12 = arith.constant dense<0.000000e+00> : vector<8x128xf32>
    %17 = tpu.matmul %14, %16, %cst_12 {dimension_numbers = #tpu.dot_dimension_numbers<[1], [0], [0], [1], [0, 0, 1, 1], [], []>} : vector<8x128xf32>, vector<128x128xf32>, vector<8x128xf32> -> vector<8x128xf32>
    %c1 = arith.constant 1 : index
    %c0_13 = arith.constant 0 : index
    %c0_14 = arith.constant 0 : index
    %18 = vector.load %arg4[%c1, %c0_13, %c0_14] : memref<7x1x128xf32, #tpu.memory_space<vmem>>, vector<1x1x128xf32>
    %19 = vector.shape_cast %18 : vector<1x1x128xf32> to vector<1x128xf32>
    %20 = vector.broadcast %19 : vector<1x128xf32> to vector<8x128xf32>
    %21 = arith.addf %17, %20 : vector<8x128xf32>
    %cst_15 = arith.constant 5.000000e-01 : f32
    %22 = vector.broadcast %cst_15 : f32 to vector<8x128xf32>
    %23 = arith.mulf %21, %22 : vector<8x128xf32>
    %24 = math.tanh %23 : vector<8x128xf32>
    %cst_16 = arith.constant 5.000000e-01 : f32
    %25 = vector.broadcast %cst_16 : f32 to vector<8x128xf32>
    %26 = arith.mulf %25, %24 : vector<8x128xf32>
    %cst_17 = arith.constant 5.000000e-01 : f32
    %27 = vector.broadcast %cst_17 : f32 to vector<8x128xf32>
    %28 = arith.addf %27, %26 : vector<8x128xf32>
    %29 = arith.mulf %21, %28 : vector<8x128xf32>
    %c1_18 = arith.constant 1 : index
    %c0_19 = arith.constant 0 : index
    %c0_20 = arith.constant 0 : index
    %30 = vector.load %arg3[%c1_18, %c0_19, %c0_20] : memref<6x128x128xf32, #tpu.memory_space<vmem>>, vector<1x128x128xf32>
    %31 = vector.shape_cast %30 : vector<1x128x128xf32> to vector<128x128xf32>
    %cst_21 = arith.constant dense<0.000000e+00> : vector<8x128xf32>
    %32 = tpu.matmul %29, %31, %cst_21 {dimension_numbers = #tpu.dot_dimension_numbers<[1], [0], [0], [1], [0, 0, 1, 1], [], []>} : vector<8x128xf32>, vector<128x128xf32>, vector<8x128xf32> -> vector<8x128xf32>
    %c2 = arith.constant 2 : index
    %c0_22 = arith.constant 0 : index
    %c0_23 = arith.constant 0 : index
    %33 = vector.load %arg4[%c2, %c0_22, %c0_23] : memref<7x1x128xf32, #tpu.memory_space<vmem>>, vector<1x1x128xf32>
    %34 = vector.shape_cast %33 : vector<1x1x128xf32> to vector<1x128xf32>
    %35 = vector.broadcast %34 : vector<1x128xf32> to vector<8x128xf32>
    %36 = arith.addf %32, %35 : vector<8x128xf32>
    %cst_24 = arith.constant 5.000000e-01 : f32
    %37 = vector.broadcast %cst_24 : f32 to vector<8x128xf32>
    %38 = arith.mulf %36, %37 : vector<8x128xf32>
    %39 = math.tanh %38 : vector<8x128xf32>
    %cst_25 = arith.constant 5.000000e-01 : f32
    %40 = vector.broadcast %cst_25 : f32 to vector<8x128xf32>
    %41 = arith.mulf %40, %39 : vector<8x128xf32>
    %cst_26 = arith.constant 5.000000e-01 : f32
    %42 = vector.broadcast %cst_26 : f32 to vector<8x128xf32>
    %43 = arith.addf %42, %41 : vector<8x128xf32>
    %44 = arith.mulf %36, %43 : vector<8x128xf32>
    %c2_27 = arith.constant 2 : index
    %c0_28 = arith.constant 0 : index
    %c0_29 = arith.constant 0 : index
    %45 = vector.load %arg3[%c2_27, %c0_28, %c0_29] : memref<6x128x128xf32, #tpu.memory_space<vmem>>, vector<1x128x128xf32>
    %46 = vector.shape_cast %45 : vector<1x128x128xf32> to vector<128x128xf32>
    %cst_30 = arith.constant dense<0.000000e+00> : vector<8x128xf32>
    %47 = tpu.matmul %44, %46, %cst_30 {dimension_numbers = #tpu.dot_dimension_numbers<[1], [0], [0], [1], [0, 0, 1, 1], [], []>} : vector<8x128xf32>, vector<128x128xf32>, vector<8x128xf32> -> vector<8x128xf32>
    %c3 = arith.constant 3 : index
    %c0_31 = arith.constant 0 : index
    %c0_32 = arith.constant 0 : index
    %48 = vector.load %arg4[%c3, %c0_31, %c0_32] : memref<7x1x128xf32, #tpu.memory_space<vmem>>, vector<1x1x128xf32>
    %49 = vector.shape_cast %48 : vector<1x1x128xf32> to vector<1x128xf32>
    %50 = vector.broadcast %49 : vector<1x128xf32> to vector<8x128xf32>
    %51 = arith.addf %47, %50 : vector<8x128xf32>
    %cst_33 = arith.constant 5.000000e-01 : f32
    %52 = vector.broadcast %cst_33 : f32 to vector<8x128xf32>
    %53 = arith.mulf %51, %52 : vector<8x128xf32>
    %54 = math.tanh %53 : vector<8x128xf32>
    %cst_34 = arith.constant 5.000000e-01 : f32
    %55 = vector.broadcast %cst_34 : f32 to vector<8x128xf32>
    %56 = arith.mulf %55, %54 : vector<8x128xf32>
    %cst_35 = arith.constant 5.000000e-01 : f32
    %57 = vector.broadcast %cst_35 : f32 to vector<8x128xf32>
    %58 = arith.addf %57, %56 : vector<8x128xf32>
    %59 = arith.mulf %51, %58 : vector<8x128xf32>
    %c3_36 = arith.constant 3 : index
    %c0_37 = arith.constant 0 : index
    %c0_38 = arith.constant 0 : index
    %60 = vector.load %arg3[%c3_36, %c0_37, %c0_38] : memref<6x128x128xf32, #tpu.memory_space<vmem>>, vector<1x128x128xf32>
    %61 = vector.shape_cast %60 : vector<1x128x128xf32> to vector<128x128xf32>
    %cst_39 = arith.constant dense<0.000000e+00> : vector<8x128xf32>
    %62 = tpu.matmul %59, %61, %cst_39 {dimension_numbers = #tpu.dot_dimension_numbers<[1], [0], [0], [1], [0, 0, 1, 1], [], []>} : vector<8x128xf32>, vector<128x128xf32>, vector<8x128xf32> -> vector<8x128xf32>
    %c4 = arith.constant 4 : index
    %c0_40 = arith.constant 0 : index
    %c0_41 = arith.constant 0 : index
    %63 = vector.load %arg4[%c4, %c0_40, %c0_41] : memref<7x1x128xf32, #tpu.memory_space<vmem>>, vector<1x1x128xf32>
    %64 = vector.shape_cast %63 : vector<1x1x128xf32> to vector<1x128xf32>
    %65 = vector.broadcast %64 : vector<1x128xf32> to vector<8x128xf32>
    %66 = arith.addf %62, %65 : vector<8x128xf32>
    %cst_42 = arith.constant 5.000000e-01 : f32
    %67 = vector.broadcast %cst_42 : f32 to vector<8x128xf32>
    %68 = arith.mulf %66, %67 : vector<8x128xf32>
    %69 = math.tanh %68 : vector<8x128xf32>
    %cst_43 = arith.constant 5.000000e-01 : f32
    %70 = vector.broadcast %cst_43 : f32 to vector<8x128xf32>
    %71 = arith.mulf %70, %69 : vector<8x128xf32>
    %cst_44 = arith.constant 5.000000e-01 : f32
    %72 = vector.broadcast %cst_44 : f32 to vector<8x128xf32>
    %73 = arith.addf %72, %71 : vector<8x128xf32>
    %74 = arith.mulf %66, %73 : vector<8x128xf32>
    %c4_45 = arith.constant 4 : index
    %c0_46 = arith.constant 0 : index
    %c0_47 = arith.constant 0 : index
    %75 = vector.load %arg3[%c4_45, %c0_46, %c0_47] : memref<6x128x128xf32, #tpu.memory_space<vmem>>, vector<1x128x128xf32>
    %76 = vector.shape_cast %75 : vector<1x128x128xf32> to vector<128x128xf32>
    %cst_48 = arith.constant dense<0.000000e+00> : vector<8x128xf32>
    %77 = tpu.matmul %74, %76, %cst_48 {dimension_numbers = #tpu.dot_dimension_numbers<[1], [0], [0], [1], [0, 0, 1, 1], [], []>} : vector<8x128xf32>, vector<128x128xf32>, vector<8x128xf32> -> vector<8x128xf32>
    %c5 = arith.constant 5 : index
    %c0_49 = arith.constant 0 : index
    %c0_50 = arith.constant 0 : index
    %78 = vector.load %arg4[%c5, %c0_49, %c0_50] : memref<7x1x128xf32, #tpu.memory_space<vmem>>, vector<1x1x128xf32>
    %79 = vector.shape_cast %78 : vector<1x1x128xf32> to vector<1x128xf32>
    %80 = vector.broadcast %79 : vector<1x128xf32> to vector<8x128xf32>
    %81 = arith.addf %77, %80 : vector<8x128xf32>
    %cst_51 = arith.constant 5.000000e-01 : f32
    %82 = vector.broadcast %cst_51 : f32 to vector<8x128xf32>
    %83 = arith.mulf %81, %82 : vector<8x128xf32>
    %84 = math.tanh %83 : vector<8x128xf32>
    %cst_52 = arith.constant 5.000000e-01 : f32
    %85 = vector.broadcast %cst_52 : f32 to vector<8x128xf32>
    %86 = arith.mulf %85, %84 : vector<8x128xf32>
    %cst_53 = arith.constant 5.000000e-01 : f32
    %87 = vector.broadcast %cst_53 : f32 to vector<8x128xf32>
    %88 = arith.addf %87, %86 : vector<8x128xf32>
    %89 = arith.mulf %81, %88 : vector<8x128xf32>
    %c5_54 = arith.constant 5 : index
    %c0_55 = arith.constant 0 : index
    %c0_56 = arith.constant 0 : index
    %90 = vector.load %arg3[%c5_54, %c0_55, %c0_56] : memref<6x128x128xf32, #tpu.memory_space<vmem>>, vector<1x128x128xf32>
    %91 = vector.shape_cast %90 : vector<1x128x128xf32> to vector<128x128xf32>
    %cst_57 = arith.constant dense<0.000000e+00> : vector<8x128xf32>
    %92 = tpu.matmul %89, %91, %cst_57 {dimension_numbers = #tpu.dot_dimension_numbers<[1], [0], [0], [1], [0, 0, 1, 1], [], []>} : vector<8x128xf32>, vector<128x128xf32>, vector<8x128xf32> -> vector<8x128xf32>
    %c6 = arith.constant 6 : index
    %c0_58 = arith.constant 0 : index
    %c0_59 = arith.constant 0 : index
    %93 = vector.load %arg4[%c6, %c0_58, %c0_59] : memref<7x1x128xf32, #tpu.memory_space<vmem>>, vector<1x1x128xf32>
    %94 = vector.shape_cast %93 : vector<1x1x128xf32> to vector<1x128xf32>
    %95 = vector.broadcast %94 : vector<1x128xf32> to vector<8x128xf32>
    %96 = arith.addf %92, %95 : vector<8x128xf32>
    %cst_60 = arith.constant 5.000000e-01 : f32
    %97 = vector.broadcast %cst_60 : f32 to vector<8x128xf32>
    %98 = arith.mulf %96, %97 : vector<8x128xf32>
    %99 = math.tanh %98 : vector<8x128xf32>
    %cst_61 = arith.constant 5.000000e-01 : f32
    %100 = vector.broadcast %cst_61 : f32 to vector<8x128xf32>
    %101 = arith.mulf %100, %99 : vector<8x128xf32>
    %cst_62 = arith.constant 5.000000e-01 : f32
    %102 = vector.broadcast %cst_62 : f32 to vector<8x128xf32>
    %103 = arith.addf %102, %101 : vector<8x128xf32>
    %104 = arith.mulf %96, %103 : vector<8x128xf32>
    %105 = vector.extract_strided_slice %104 {offsets = [0, 0], sizes = [8, 3], strides = [1, 1]} : vector<8x128xf32> to vector<8x3xf32>
    %c0_63 = arith.constant 0 : index
    %c0_64 = arith.constant 0 : index
    %106 = vector.load %arg5[%c0_63, %c0_64] : memref<8x3xf32, #tpu.memory_space<vmem>>, vector<8x3xf32>
    tpu.vector_store %arg5[%c0_63, %c0_64], %105 {strides = array<i32>} : memref<8x3xf32, #tpu.memory_space<vmem>>, vector<8x3xf32>,
    return
  }
  func.func @transform_0(%arg0: i32) -> (i32, i32) {
    %c0_i32 = arith.constant 0 : i32
    %c0_i32_0 = arith.constant 0 : i32
    return %arg0, %c0_i32 : i32, i32
  }
  func.func @transform_1(%arg0: i32) -> (i32, i32) {
    %c0_i32 = arith.constant 0 : i32
    %c0_i32_0 = arith.constant 0 : i32
    %c0_i32_1 = arith.constant 0 : i32
    return %c0_i32, %c0_i32_0 : i32, i32
  }
  func.func @transform_2(%arg0: i32) -> (i32, i32, i32) {
    %c0_i32 = arith.constant 0 : i32
    %c0_i32_0 = arith.constant 0 : i32
    %c0_i32_1 = arith.constant 0 : i32
    %c0_i32_2 = arith.constant 0 : i32
    return %c0_i32, %c0_i32_0, %c0_i32_1 : i32, i32, i32
  }
  func.func @transform_3(%arg0: i32) -> (i32, i32, i32) {
    %c0_i32 = arith.constant 0 : i32
    %c0_i32_0 = arith.constant 0 : i32
    %c0_i32_1 = arith.constant 0 : i32
    %c0_i32_2 = arith.constant 0 : i32
    return %c0_i32, %c0_i32_0, %c0_i32_1 : i32, i32, i32
  }
  func.func @transform_4(%arg0: i32) -> (i32, i32) {
    %c0_i32 = arith.constant 0 : i32
    %c0_i32_0 = arith.constant 0 : i32
    return %arg0, %c0_i32 : i32, i32
  }
}

</mosaic_0001>

<bundles_post_ra>
// kernel: mlp_forward.1
= control target key start
LH: loop header
LB: loop body
LE: loop exit
PB: predicated region body
PF: predicated region fallthrough
CT: control target
= control target key end

     0   :  { %9 = vsyncpa [#allocation3], 0  ;;  %s1099_s15 = smov [#allocation2]   ;;  %s1273_s0 = inlined_call_operand.vmem [shape: f32[8,8], index: 0, kind: input, shape index: {}]   ;;  %s1274_s1 = inlined_call_operand.vmem [shape: f32[8,128], index: 1, kind: input, shape index: {}]   ;;  %s1275_s2 = inlined_call_operand.hbm [shape: f32[6,128,128], index: 2, kind: input, shape index: {}]   ;;  %s1276_s3 = inlined_call_operand.vmem [shape: f32[7,1,128], index: 3, kind: input, shape index: {}]   ;;  %s1277_s4 = inlined_call_operand.vmem [shape: f32[8,3], index: 4, kind: output, shape index: {}]  }
   0x1   :  { %s19_s16 = sshll.u32 %s1099_s15, 4  ;;  %s20_s16 = int_to_ptr.vmem [resolvable:$true] %s19_s16 }
   0x2   :  { %s1085_s17 = scalar_lea.vmem %s20_s16, 12288  ;;  %p1090_p1 = scmp.lt.s32.totalorder %s20_s16, %s20_s16 }
   0x3   :  { %p1086_p0 = scmp.ne.s32.totalorder %s20_s16, %s1085_s17  ;;  %p1091_p2 = scmp.lt.s32.totalorder %s1085_s17, %s1085_s17 }
   0x5   :  { %p1092_p3 = por %p1091_p2, %p1090_p1 }
   0x7   :  { %p1093_p4 = pnand %p1092_p3, %p1086_p0 }
   0x9   :  { %1096 = shalt.err (!%p1093_p4)
}
   0xa   :  { %s1100_s18 = smov 128   ;;  %s1101_s19 = smov 8  }
   0xb   :  { %25 = dma.hbm_to_vmem [thread:$0]  %s1275_s2, 12288, %s20_s16, [#allocation3], %s1100_s18, %s1100_s18, %s1101_s19  }
   0xc   :  { %1097 = dma.done.wait [#allocation3], 12288  }
   0xd   :  { %1098 = vsyncadd [#allocation3], 4294955008  ;;  %v1102_v0 = vmov 0.0   ;;  %vm1103_vm0 = vmmov 0   ;;  %vm40_vm1 = vcmask 64512   ;;  %v32_v1 = vld [vmem:[%s1274_s1] sm:$0xff] }
   0xe   :  { %843 = vmatprep.subr.mxu0 %v1102_v0  ;;  %845 = vmatprep.mubr.msk.f32.mxu0 %vm1103_vm0, %v1102_v0  ;;  %v31_v2 = vld [vmem:[%s1273_s0] sm:$0xff]  ;;  %v134_v3 = vld [vmem:[#allocation2 + $0x78] sm:$0xff]  ;;  %v133_v4 = vld [vmem:[#allocation2 + $0x70] sm:$0xff]  ;;  %vm718_vm2 = vcmask 23552  }
   0xf   :  { %848 = vmatprep.subr.mxu1 %v1102_v0  ;;  %880 = vmatprep.mubr.msk.f32.mxu1 %vm1103_vm0, %v1102_v0  ;;  %v132_v5 = vld [vmem:[#allocation2 + $0x68] sm:$0xff]  ;;  %v131_v6 = vld [vmem:[#allocation2 + $0x60] sm:$0xff]  ;;  %v130_v7 = vld [vmem:[#allocation2 + $0x58] sm:$0xff] }
  0x10   :  { %844 = vmatpush3.msra.mxu0 %v32_v1  ;;  %849 = vmatpush3.msra.mxu1 %v134_v3  ;;  %v129_v8 = vld [vmem:[#allocation2 + $0x50] sm:$0xff]  ;;  %v128_v9 = vld [vmem:[#allocation2 + $0x48] sm:$0xff]  ;;  %v127_v10 = vld [vmem:[#allocation2 + $0x40] sm:$0xff] }
  0x11   :  { %846 = vmatmul.mubr.msk.f32.vlgmr.msra.gmra.mxu0 %vm40_vm1, %v31_v2  ;;  %850 = vmatprep.subr.mxu1 %v1102_v0  ;;  %v126_v11 = vld [vmem:[#allocation2 + $0x38] sm:$0xff]  ;;  %v125_v12 = vld [vmem:[#allocation2 + $0x30] sm:$0xff]  ;;  %v124_v13 = vld [vmem:[#allocation2 + $0x28] sm:$0xff] }
  0x12   :  { %851 = vmatpush3.msra.mxu1 %v133_v4  ;;  %883 = vmatprep.subr.mxu0 %v1102_v0  ;;  %v123_v14 = vld [vmem:[#allocation2 + $0x20] sm:$0xff]  ;;  %v122_v15 = vld [vmem:[#allocation2 + $0x18] sm:$0xff]  ;;  %v121_v16 = vld [vmem:[#allocation2 + $0x10] sm:$0xff] }
  0x13   :  { %852 = vmatprep.subr.mxu1 %v1102_v0  ;;  %915 = vmatprep.mubr.msk.f32.mxu0 %vm1103_vm0, %v1102_v0  ;;  %v120_v17 = vld [vmem:[#allocation2 + $0x8] sm:$0xff]  ;;  %v119_v18 = vld [vmem:[#allocation2] sm:$0xff]  ;;  %v234_v19 = vld [vmem:[#allocation2 + $0xf8] sm:$0xff] }
  0x14   :  { %853 = vmatpush3.msra.mxu1 %v132_v5  ;;  %v233_v20 = vld [vmem:[#allocation2 + $0xf0] sm:$0xff]  ;;  %884 = vmatpush3.msra.mxu0 %v234_v19  ;;  %v232_v21 = vld [vmem:[#allocation2 + $0xe8] sm:$0xff]  ;;  %v725_v22 = vld [vmem:[%s1276_s3] ss:$0 sm:$0xff] }
  0x15   :  { %854 = vmatprep.subr.mxu1 %v1102_v0  ;;  %885 = vmatprep.subr.mxu0 %v1102_v0  ;;  %v231_v31 = vld [vmem:[#allocation2 + $0xe0] sm:$0xff]  ;;  %v230_v32 = vld [vmem:[#allocation2 + $0xd8] sm:$0xff]  ;;  %v229_v33 = vld [vmem:[#allocation2 + $0xd0] sm:$0xff] }
  0x16   :  { %855 = vmatpush3.msra.mxu1 %v131_v6  ;;  %886 = vmatpush3.msra.mxu0 %v233_v20  ;;  %v228_v34 = vld [vmem:[#allocation2 + $0xc8] sm:$0xff]  ;;  %v227_v35 = vld [vmem:[#allocation2 + $0xc0] sm:$0xff]  ;;  %v226_v36 = vld [vmem:[#allocation2 + $0xb8] sm:$0xff] }
  0x17   :  { %856 = vmatprep.subr.mxu1 %v1102_v0  ;;  %887 = vmatprep.subr.mxu0 %v1102_v0  ;;  %v225_v37 = vld [vmem:[#allocation2 + $0xb0] sm:$0xff]  ;;  %v224_v38 = vld [vmem:[#allocation2 + $0xa8] sm:$0xff]  ;;  %v223_v39 = vld [vmem:[#allocation2 + $0xa0] sm:$0xff] }
  0x18   :  { %857 = vmatpush3.msra.mxu1 %v130_v7  ;;  %888 = vmatpush3.msra.mxu0 %v232_v21  ;;  %v222_v40 = vld [vmem:[#allocation2 + $0x98] sm:$0xff]  ;;  %v221_v41 = vld [vmem:[#allocation2 + $0x90] sm:$0xff]  ;;  %v220_v42 = vld [vmem:[#allocation2 + $0x88] sm:$0xff] }
  0x19   :  { %858 = vmatprep.subr.mxu1 %v1102_v0  ;;  %889 = vmatprep.subr.mxu0 %v1102_v0  ;;  %v219_v43 = vld [vmem:[#allocation2 + $0x80] sm:$0xff]  ;;  %v334_v44 = vld [vmem:[#allocation2 + $0x178] sm:$0xff]  ;;  %v333_v45 = vld [vmem:[#allocation2 + $0x170] sm:$0xff] }
  0x1a   :  { %859 = vmatpush3.msra.mxu1 %v129_v8  ;;  %890 = vmatpush3.msra.mxu0 %v231_v31  ;;  %v332_v46 = vld [vmem:[#allocation2 + $0x168] sm:$0xff]  ;;  %v728_v47 = vld [vmem:[%s1276_s3 + $0x1] ss:$0 sm:$0xff]  ;;  %v330_v57 = vld [vmem:[#allocation2 + $0x158] sm:$0xff] }
  0x1b   :  { %860 = vmatprep.subr.mxu1 %v1102_v0  ;;  %891 = vmatprep.subr.mxu0 %v1102_v0  ;;  %v331_v56 = vld [vmem:[#allocation2 + $0x160] sm:$0xff]  ;;  %v329_v58 = vld [vmem:[#allocation2 + $0x150] sm:$0xff]  ;;  %v328_v59 = vld [vmem:[#allocation2 + $0x148] sm:$0xff] }
  0x1c   :  { %861 = vmatpush3.msra.mxu1 %v128_v9  ;;  %892 = vmatpush3.msra.mxu0 %v230_v32  ;;  %v327_v60 = vld [vmem:[#allocation2 + $0x140] sm:$0xff]  ;;  %v326_v61 = vld [vmem:[#allocation2 + $0x138] sm:$0xff]  ;;  %v325_v62 = vld [vmem:[#allocation2 + $0x130] sm:$0xff] }
  0x1d   :  { %862 = vmatprep.subr.mxu1 %v1102_v0  ;;  %893 = vmatprep.subr.mxu0 %v1102_v0  ;;  %v324_v63 = vld [vmem:[#allocation2 + $0x128] sm:$0xff]  ;;  %v323_v1 = vld [vmem:[#allocation2 + $0x120] sm:$0xff]  ;;  %v322_v2 = vld [vmem:[#allocation2 + $0x118] sm:$0xff] }
  0x1e   :  { %863 = vmatpush3.msra.mxu1 %v127_v10  ;;  %894 = vmatpush3.msra.mxu0 %v229_v33  ;;  %v321_v3 = vld [vmem:[#allocation2 + $0x110] sm:$0xff]  ;;  %v320_v4 = vld [vmem:[#allocation2 + $0x108] sm:$0xff]  ;;  %v319_v5 = vld [vmem:[#allocation2 + $0x100] sm:$0xff] }
  0x1f   :  { %864 = vmatprep.subr.mxu1 %v1102_v0  ;;  %895 = vmatprep.subr.mxu0 %v1102_v0  ;;  %v434_v6 = vld [vmem:[#allocation2 + $0x1f8] sm:$0xff]  ;;  %v433_v7 = vld [vmem:[#allocation2 + $0x1f0] sm:$0xff]  ;;  %v432_v8 = vld [vmem:[#allocation2 + $0x1e8] sm:$0xff] }
  0x20   :  { %865 = vmatpush3.msra.mxu1 %v126_v11  ;;  %896 = vmatpush3.msra.mxu0 %v228_v34  ;;  %v730_v9 = vld [vmem:[%s1276_s3 + $0x2] ss:$0 sm:$0xff]  ;;  %v430_v19 = vld [vmem:[#allocation2 + $0x1d8] sm:$0xff]  ;;  %v429_v20 = vld [vmem:[#allocation2 + $0x1d0] sm:$0xff] }
  0x21   :  { %866 = vmatprep.subr.mxu1 %v1102_v0  ;;  %897 = vmatprep.subr.mxu0 %v1102_v0  ;;  %v428_v21 = vld [vmem:[#allocation2 + $0x1c8] sm:$0xff]  ;;  %v534_v31 = vld [vmem:[#allocation2 + $0x278] sm:$0xff]  ;;  %v533_v32 = vld [vmem:[#allocation2 + $0x270] sm:$0xff] }
  0x22   :  { %867 = vmatpush3.msra.mxu1 %v125_v12  ;;  %898 = vmatpush3.msra.mxu0 %v227_v35  ;;  %v532_v33 = vld [vmem:[#allocation2 + $0x268] sm:$0xff]  ;;  %v732_v34 = vld [vmem:[%s1276_s3 + $0x3] ss:$0 sm:$0xff] }
  0x23   :  { %868 = vmatprep.subr.mxu1 %v1102_v0  ;;  %899 = vmatprep.subr.mxu0 %v1102_v0 }
  0x24   :  { %869 = vmatpush3.msra.mxu1 %v124_v13  ;;  %900 = vmatpush3.msra.mxu0 %v226_v36 }
  0x25   :  { %870 = vmatprep.subr.mxu1 %v1102_v0  ;;  %901 = vmatprep.subr.mxu0 %v1102_v0 }
  0x26   :  { %871 = vmatpush3.msra.mxu1 %v123_v14  ;;  %902 = vmatpush3.msra.mxu0 %v225_v37 }
  0x27   :  { %872 = vmatprep.subr.mxu1 %v1102_v0  ;;  %903 = vmatprep.subr.mxu0 %v1102_v0 }
  0x28   :  { %873 = vmatpush3.msra.mxu1 %v122_v15  ;;  %904 = vmatpush3.msra.mxu0 %v224_v38 }
  0x29   :  { %874 = vmatprep.subr.mxu1 %v1102_v0  ;;  %905 = vmatprep.subr.mxu0 %v1102_v0 }
  0x2a   :  { %875 = vmatpush3.msra.mxu1 %v121_v16  ;;  %906 = vmatpush3.msra.mxu0 %v223_v39 }
  0x2b   :  { %876 = vmatprep.subr.mxu1 %v1102_v0  ;;  %907 = vmatprep.subr.mxu0 %v1102_v0 }
  0x2c   :  { %877 = vmatpush3.msra.mxu1 %v120_v17  ;;  %908 = vmatpush3.msra.mxu0 %v222_v40 }
  0x2d   :  { %878 = vmatprep.subr.mxu1 %v1102_v0  ;;  %909 = vmatprep.subr.mxu0 %v1102_v0 }
  0x2e   :  { %879 = vmatpush3.msra.mxu1 %v119_v18  ;;  %910 = vmatpush3.msra.mxu0 %v221_v41  ;;  %v431_v18 = vld [vmem:[#allocation2 + $0x1e0] sm:$0xff] }
  0x2f   :  { %918 = vmatprep.subr.mxu1 %v1102_v0  ;;  %911 = vmatprep.subr.mxu0 %v1102_v0 }
  0x30   :  { %912 = vmatpush3.msra.mxu0 %v220_v42 }
  0x31   :  { %913 = vmatprep.subr.mxu0 %v1102_v0 }
  0x32   :  { %914 = vmatpush3.msra.mxu0 %v219_v43  ;;  %v531_v43 = vld [vmem:[#allocation2 + $0x260] sm:$0xff] }
  0x33   :  { %953 = vmatprep.subr.mxu0 %v1102_v0 }
  0xd1   :  { %v110_v23 = vpop.f32.mrf.mxu0 }
  0xd2   :  { %v111_v24 = vadd.f32 %v725_v22, %v110_v23  ;;  %v427_v22 = vld [vmem:[#allocation2 + $0x1c0] sm:$0xff]  ;;  %v426_v23 = vld [vmem:[#allocation2 + $0x1b8] sm:$0xff] }
  0xd3   :  { %v847_v25 = vpop.f32.mrf.mxu0 }
  0xd4   :  { %v114_v26 = vmul.f32 0.5, %v111_v24  ;;  %v424_v25 = vld [vmem:[#allocation2 + $0x1a8] sm:$0xff] }
  0xd6   :  { %1063 = vtanh.f32 %v114_v26  ;;  %v423_v26 = vld [vmem:[#allocation2 + $0x1a0] sm:$0xff] }
  0xe3   :  { %v1064_v27 = vpop.eup %1063 }
  0xe4   :  { %v116_v28 = vmul.f32 0.5, %v1064_v27  ;;  %v422_v27 = vld [vmem:[#allocation2 + $0x198] sm:$0xff] }
  0xe6   :  { %v117_v29 = vadd.f32 0.5, %v116_v28  ;;  %v421_v28 = vld [vmem:[#allocation2 + $0x190] sm:$0xff] }
  0xe8   :  { %v118_v30 = vmul.f32 %v117_v29, %v111_v24  ;;  %v425_v24 = vld [vmem:[#allocation2 + $0x1b0] sm:$0xff]  ;;  %v420_v29 = vld [vmem:[#allocation2 + $0x188] sm:$0xff] }
  0xea   :  { %881 = vmatmul.mubr.f32.vlgmr.msra.gmra.mxu1 %v118_v30  ;;  %v419_v30 = vld [vmem:[#allocation2 + $0x180] sm:$0xff] }
  0xeb   :  { %950 = vmatprep.mubr.msk.f32.mxu1 %vm1103_vm0, %v1102_v0  ;;  %919 = vmatpush3.msra.mxu1 %v334_v44  ;;  %v530_v44 = vld [vmem:[#allocation2 + $0x258] sm:$0xff] }
  0xec   :  { %920 = vmatprep.subr.mxu1 %v1102_v0 }
  0xed   :  { %921 = vmatpush3.msra.mxu1 %v333_v45  ;;  %v529_v45 = vld [vmem:[#allocation2 + $0x250] sm:$0xff] }
  0xee   :  { %922 = vmatprep.subr.mxu1 %v1102_v0 }
  0xef   :  { %923 = vmatpush3.msra.mxu1 %v332_v46  ;;  %v528_v46 = vld [vmem:[#allocation2 + $0x248] sm:$0xff] }
  0xf0   :  { %924 = vmatprep.subr.mxu1 %v1102_v0 }
  0xf1   :  { %925 = vmatpush3.msra.mxu1 %v331_v56  ;;  %v634_v56 = vld [vmem:[#allocation2 + $0x2f8] sm:$0xff] }
  0xf2   :  { %926 = vmatprep.subr.mxu1 %v1102_v0 }
  0xf3   :  { %927 = vmatpush3.msra.mxu1 %v330_v57  ;;  %v633_v57 = vld [vmem:[#allocation2 + $0x2f0] sm:$0xff] }
  0xf4   :  { %928 = vmatprep.subr.mxu1 %v1102_v0 }
  0xf5   :  { %929 = vmatpush3.msra.mxu1 %v329_v58  ;;  %v632_v58 = vld [vmem:[#allocation2 + $0x2e8] sm:$0xff] }
  0xf6   :  { %930 = vmatprep.subr.mxu1 %v1102_v0 }
  0xf7   :  { %931 = vmatpush3.msra.mxu1 %v328_v59  ;;  %v734_v59 = vld [vmem:[%s1276_s3 + $0x4] ss:$0 sm:$0xff] }
  0xf8   :  { %932 = vmatprep.subr.mxu1 %v1102_v0 }
  0xf9   :  { %933 = vmatpush3.msra.mxu1 %v327_v60 }
  0xfa   :  { %934 = vmatprep.subr.mxu1 %v1102_v0 }
  0xfb   :  { %935 = vmatpush3.msra.mxu1 %v326_v61 }
  0xfc   :  { %936 = vmatprep.subr.mxu1 %v1102_v0 }
  0xfd   :  { %937 = vmatpush3.msra.mxu1 %v325_v62 }
  0xfe   :  { %938 = vmatprep.subr.mxu1 %v1102_v0 }
  0xff   :  { %939 = vmatpush3.msra.mxu1 %v324_v63 }
 0x100   :  { %940 = vmatprep.subr.mxu1 %v1102_v0 }
 0x101   :  { %941 = vmatpush3.msra.mxu1 %v323_v1 }
 0x102   :  { %942 = vmatprep.subr.mxu1 %v1102_v0 }
 0x103   :  { %943 = vmatpush3.msra.mxu1 %v322_v2 }
 0x104   :  { %944 = vmatprep.subr.mxu1 %v1102_v0 }
 0x105   :  { %945 = vmatpush3.msra.mxu1 %v321_v3 }
 0x106   :  { %946 = vmatprep.subr.mxu1 %v1102_v0 }
 0x107   :  { %947 = vmatpush3.msra.mxu1 %v320_v4 }
 0x108   :  { %948 = vmatprep.subr.mxu1 %v1102_v0 }
 0x109   :  { %949 = vmatpush3.msra.mxu1 %v319_v5  ;;  %v631_v5 = vld [vmem:[#allocation2 + $0x2e0] sm:$0xff] }
 0x10a   :  { %988 = vmatprep.subr.mxu1 %v1102_v0 }
 0x1aa   :  { %v209_v48 = vpop.f32.mrf.mxu1 }
 0x1ab   :  { %v210_v49 = vadd.f32 %v728_v47, %v209_v48  ;;  %v527_v47 = vld [vmem:[#allocation2 + $0x240] sm:$0xff]  ;;  %v526_v48 = vld [vmem:[#allocation2 + $0x238] sm:$0xff] }
 0x1ac   :  { %v882_v50 = vpop.f32.mrf.mxu1 }
 0x1ad   :  { %v213_v51 = vmul.f32 0.5, %v210_v49  ;;  %v524_v50 = vld [vmem:[#allocation2 + $0x228] sm:$0xff] }
 0x1af   :  { %1065 = vtanh.f32 %v213_v51  ;;  %v523_v51 = vld [vmem:[#allocation2 + $0x220] sm:$0xff] }
 0x1bc   :  { %v1066_v52 = vpop.eup %1065 }
 0x1bd   :  { %v215_v53 = vmul.f32 0.5, %v1066_v52  ;;  %v522_v52 = vld [vmem:[#allocation2 + $0x218] sm:$0xff] }
 0x1bf   :  { %v216_v54 = vadd.f32 0.5, %v215_v53  ;;  %v521_v53 = vld [vmem:[#allocation2 + $0x210] sm:$0xff] }
 0x1c1   :  { %v217_v55 = vmul.f32 %v216_v54, %v210_v49  ;;  %v525_v49 = vld [vmem:[#allocation2 + $0x230] sm:$0xff]  ;;  %v520_v54 = vld [vmem:[#allocation2 + $0x208] sm:$0xff] }
 0x1c3   :  { %916 = vmatmul.mubr.f32.vlgmr.msra.gmra.mxu0 %v217_v55  ;;  %v519_v55 = vld [vmem:[#allocation2 + $0x200] sm:$0xff] }
 0x1c4   :  { %985 = vmatprep.mubr.msk.f32.mxu0 %vm1103_vm0, %v1102_v0  ;;  %954 = vmatpush3.msra.mxu0 %v434_v6  ;;  %v630_v6 = vld [vmem:[#allocation2 + $0x2d8] sm:$0xff] }
 0x1c5   :  { %955 = vmatprep.subr.mxu0 %v1102_v0 }
 0x1c6   :  { %956 = vmatpush3.msra.mxu0 %v433_v7  ;;  %v629_v7 = vld [vmem:[#allocation2 + $0x2d0] sm:$0xff] }
 0x1c7   :  { %957 = vmatprep.subr.mxu0 %v1102_v0 }
 0x1c8   :  { %958 = vmatpush3.msra.mxu0 %v432_v8  ;;  %v628_v8 = vld [vmem:[#allocation2 + $0x2c8] sm:$0xff] }
 0x1c9   :  { %959 = vmatprep.subr.mxu0 %v1102_v0 }
 0x1ca   :  { %960 = vmatpush3.msra.mxu0 %v431_v18  ;;  %v736_v18 = vld [vmem:[%s1276_s3 + $0x5] ss:$0 sm:$0xff] }
 0x1cb   :  { %961 = vmatprep.subr.mxu0 %v1102_v0 }
 0x1cc   :  { %962 = vmatpush3.msra.mxu0 %v430_v19 }
 0x1cd   :  { %963 = vmatprep.subr.mxu0 %v1102_v0 }
 0x1ce   :  { %964 = vmatpush3.msra.mxu0 %v429_v20 }
 0x1cf   :  { %965 = vmatprep.subr.mxu0 %v1102_v0 }
 0x1d0   :  { %966 = vmatpush3.msra.mxu0 %v428_v21 }
 0x1d1   :  { %967 = vmatprep.subr.mxu0 %v1102_v0 }
 0x1d2   :  { %968 = vmatpush3.msra.mxu0 %v427_v22 }
 0x1d3   :  { %969 = vmatprep.subr.mxu0 %v1102_v0 }
 0x1d4   :  { %970 = vmatpush3.msra.mxu0 %v426_v23 }
 0x1d5   :  { %971 = vmatprep.subr.mxu0 %v1102_v0 }
 0x1d6   :  { %972 = vmatpush3.msra.mxu0 %v425_v24 }
 0x1d7   :  { %973 = vmatprep.subr.mxu0 %v1102_v0 }
 0x1d8   :  { %974 = vmatpush3.msra.mxu0 %v424_v25 }
 0x1d9   :  { %975 = vmatprep.subr.mxu0 %v1102_v0 }
 0x1da   :  { %976 = vmatpush3.msra.mxu0 %v423_v26 }
 0x1db   :  { %977 = vmatprep.subr.mxu0 %v1102_v0 }
 0x1dc   :  { %978 = vmatpush3.msra.mxu0 %v422_v27 }
 0x1dd   :  { %979 = vmatprep.subr.mxu0 %v1102_v0 }
 0x1de   :  { %980 = vmatpush3.msra.mxu0 %v421_v28 }
 0x1df   :  { %981 = vmatprep.subr.mxu0 %v1102_v0 }
 0x1e0   :  { %982 = vmatpush3.msra.mxu0 %v420_v29 }
 0x1e1   :  { %983 = vmatprep.subr.mxu0 %v1102_v0 }
 0x1e2   :  { %984 = vmatpush3.msra.mxu0 %v419_v30 }
 0x1e3   :  { %1023 = vmatprep.subr.mxu0 %v1102_v0 }
 0x283   :  { %v309_v10 = vpop.f32.mrf.mxu0 }
 0x284   :  { %v310_v11 = vadd.f32 %v730_v9, %v309_v10  ;;  %v627_v9 = vld [vmem:[#allocation2 + $0x2c0] sm:$0xff]  ;;  %v626_v10 = vld [vmem:[#allocation2 + $0x2b8] sm:$0xff] }
 0x285   :  { %v917_v12 = vpop.f32.mrf.mxu0 }
 0x286   :  { %v313_v13 = vmul.f32 0.5, %v310_v11  ;;  %v624_v12 = vld [vmem:[#allocation2 + $0x2a8] sm:$0xff] }
 0x288   :  { %1067 = vtanh.f32 %v313_v13  ;;  %v623_v13 = vld [vmem:[#allocation2 + $0x2a0] sm:$0xff] }
 0x295   :  { %v1068_v14 = vpop.eup %1067 }
 0x296   :  { %v315_v15 = vmul.f32 0.5, %v1068_v14  ;;  %v622_v14 = vld [vmem:[#allocation2 + $0x298] sm:$0xff] }
 0x298   :  { %v316_v16 = vadd.f32 0.5, %v315_v15  ;;  %v621_v15 = vld [vmem:[#allocation2 + $0x290] sm:$0xff] }
 0x29a   :  { %v317_v17 = vmul.f32 %v316_v16, %v310_v11  ;;  %v625_v11 = vld [vmem:[#allocation2 + $0x2b0] sm:$0xff]  ;;  %v620_v16 = vld [vmem:[#allocation2 + $0x288] sm:$0xff] }
 0x29c   :  { %951 = vmatmul.mubr.f32.vlgmr.msra.gmra.mxu1 %v317_v17  ;;  %v619_v17 = vld [vmem:[#allocation2 + $0x280] sm:$0xff] }
 0x29d   :  { %1020 = vmatprep.mubr.msk.f32.mxu1 %vm1103_vm0, %v1102_v0  ;;  %989 = vmatpush3.msra.mxu1 %v534_v31 }
 0x29e   :  { %990 = vmatprep.subr.mxu1 %v1102_v0 }
 0x29f   :  { %991 = vmatpush3.msra.mxu1 %v533_v32 }
 0x2a0   :  { %992 = vmatprep.subr.mxu1 %v1102_v0 }
 0x2a1   :  { %993 = vmatpush3.msra.mxu1 %v532_v33 }
 0x2a2   :  { %994 = vmatprep.subr.mxu1 %v1102_v0 }
 0x2a3   :  { %995 = vmatpush3.msra.mxu1 %v531_v43 }
 0x2a4   :  { %996 = vmatprep.subr.mxu1 %v1102_v0 }
 0x2a5   :  { %997 = vmatpush3.msra.mxu1 %v530_v44 }
 0x2a6   :  { %998 = vmatprep.subr.mxu1 %v1102_v0 }
 0x2a7   :  { %999 = vmatpush3.msra.mxu1 %v529_v45 }
 0x2a8   :  { %1000 = vmatprep.subr.mxu1 %v1102_v0 }
 0x2a9   :  { %1001 = vmatpush3.msra.mxu1 %v528_v46 }
 0x2aa   :  { %1002 = vmatprep.subr.mxu1 %v1102_v0 }
 0x2ab   :  { %1003 = vmatpush3.msra.mxu1 %v527_v47 }
 0x2ac   :  { %1004 = vmatprep.subr.mxu1 %v1102_v0 }
 0x2ad   :  { %1005 = vmatpush3.msra.mxu1 %v526_v48 }
 0x2ae   :  { %1006 = vmatprep.subr.mxu1 %v1102_v0 }
 0x2af   :  { %1007 = vmatpush3.msra.mxu1 %v525_v49 }
 0x2b0   :  { %1008 = vmatprep.subr.mxu1 %v1102_v0 }
 0x2b1   :  { %1009 = vmatpush3.msra.mxu1 %v524_v50 }
 0x2b2   :  { %1010 = vmatprep.subr.mxu1 %v1102_v0 }
 0x2b3   :  { %1011 = vmatpush3.msra.mxu1 %v523_v51 }
 0x2b4   :  { %1012 = vmatprep.subr.mxu1 %v1102_v0 }
 0x2b5   :  { %1013 = vmatpush3.msra.mxu1 %v522_v52 }
 0x2b6   :  { %1014 = vmatprep.subr.mxu1 %v1102_v0 }
 0x2b7   :  { %1015 = vmatpush3.msra.mxu1 %v521_v53 }
 0x2b8   :  { %1016 = vmatprep.subr.mxu1 %v1102_v0 }
 0x2b9   :  { %1017 = vmatpush3.msra.mxu1 %v520_v54 }
 0x2ba   :  { %1018 = vmatprep.subr.mxu1 %v1102_v0 }
 0x2bb   :  { %1019 = vmatpush3.msra.mxu1 %v519_v55 }
 0x35c   :  { %v409_v35 = vpop.f32.mrf.mxu1 }
 0x35d   :  { %v410_v36 = vadd.f32 %v732_v34, %v409_v35 }
 0x35e   :  { %v952_v37 = vpop.f32.mrf.mxu1 }
 0x35f   :  { %v413_v38 = vmul.f32 0.5, %v410_v36 }
 0x361   :  { %1069 = vtanh.f32 %v413_v38 }
 0x36e   :  { %v1070_v39 = vpop.eup %1069 }
 0x36f   :  { %v415_v40 = vmul.f32 0.5, %v1070_v39 }
 0x371   :  { %v416_v41 = vadd.f32 0.5, %v415_v40 }
 0x373   :  { %v417_v42 = vmul.f32 %v416_v41, %v410_v36 }
 0x375   :  { %986 = vmatmul.mubr.f32.vlgmr.msra.gmra.mxu0 %v417_v42 }
 0x376   :  { %1055 = vmatprep.mubr.msk.f32.mxu0 %vm1103_vm0, %v1102_v0  ;;  %1024 = vmatpush3.msra.mxu0 %v634_v56 }
 0x377   :  { %1025 = vmatprep.subr.mxu0 %v1102_v0 }
 0x378   :  { %1026 = vmatpush3.msra.mxu0 %v633_v57 }
 0x379   :  { %1027 = vmatprep.subr.mxu0 %v1102_v0 }
 0x37a   :  { %1028 = vmatpush3.msra.mxu0 %v632_v58 }
 0x37b   :  { %1029 = vmatprep.subr.mxu0 %v1102_v0 }
 0x37c   :  { %1030 = vmatpush3.msra.mxu0 %v631_v5 }
 0x37d   :  { %1031 = vmatprep.subr.mxu0 %v1102_v0 }
 0x37e   :  { %1032 = vmatpush3.msra.mxu0 %v630_v6 }
 0x37f   :  { %1033 = vmatprep.subr.mxu0 %v1102_v0 }
 0x380   :  { %1034 = vmatpush3.msra.mxu0 %v629_v7 }
 0x381   :  { %1035 = vmatprep.subr.mxu0 %v1102_v0 }
 0x382   :  { %1036 = vmatpush3.msra.mxu0 %v628_v8 }
 0x383   :  { %1037 = vmatprep.subr.mxu0 %v1102_v0 }
 0x384   :  { %1038 = vmatpush3.msra.mxu0 %v627_v9 }
 0x385   :  { %1039 = vmatprep.subr.mxu0 %v1102_v0 }
 0x386   :  { %1040 = vmatpush3.msra.mxu0 %v626_v10 }
 0x387   :  { %1041 = vmatprep.subr.mxu0 %v1102_v0 }
 0x388   :  { %1042 = vmatpush3.msra.mxu0 %v625_v11 }
 0x389   :  { %1043 = vmatprep.subr.mxu0 %v1102_v0 }
 0x38a   :  { %1044 = vmatpush3.msra.mxu0 %v624_v12 }
 0x38b   :  { %1045 = vmatprep.subr.mxu0 %v1102_v0 }
 0x38c   :  { %1046 = vmatpush3.msra.mxu0 %v623_v13 }
 0x38d   :  { %1047 = vmatprep.subr.mxu0 %v1102_v0 }
 0x38e   :  { %1048 = vmatpush3.msra.mxu0 %v622_v14 }
 0x38f   :  { %1049 = vmatprep.subr.mxu0 %v1102_v0 }
 0x390   :  { %1050 = vmatpush3.msra.mxu0 %v621_v15 }
 0x391   :  { %1051 = vmatprep.subr.mxu0 %v1102_v0 }
 0x392   :  { %1052 = vmatpush3.msra.mxu0 %v620_v16 }
 0x393   :  { %1053 = vmatprep.subr.mxu0 %v1102_v0  ;;  %v738_v0 = vld [vmem:[%s1276_s3 + $0x6] ss:$0 sm:$0xff] }
 0x394   :  { %1054 = vmatpush3.msra.mxu0 %v619_v17 }
 0x435   :  { %v509_v60 = vpop.f32.mrf.mxu0 }
 0x436   :  { %v510_v61 = vadd.f32 %v734_v59, %v509_v60 }
 0x437   :  { %v987_v62 = vpop.f32.mrf.mxu0 }
 0x438   :  { %v513_v63 = vmul.f32 0.5, %v510_v61 }
 0x43a   :  { %1071 = vtanh.f32 %v513_v63 }
 0x447   :  { %v1072_v1 = vpop.eup %1071 }
 0x448   :  { %v515_v2 = vmul.f32 0.5, %v1072_v1 }
 0x44a   :  { %v516_v3 = vadd.f32 0.5, %v515_v2 }
 0x44c   :  { %v517_v4 = vmul.f32 %v516_v3, %v510_v61 }
 0x44e   :  { %1021 = vmatmul.mubr.f32.vlgmr.msra.gmra.mxu1 %v517_v4 }
 0x50e   :  { %v609_v19 = vpop.f32.mrf.mxu1 }
 0x50f   :  { %v610_v20 = vadd.f32 %v736_v18, %v609_v19 }
 0x510   :  { %v1022_v21 = vpop.f32.mrf.mxu1 }
 0x511   :  { %v613_v22 = vmul.f32 0.5, %v610_v20 }
 0x513   :  { %1073 = vtanh.f32 %v613_v22 }
 0x520   :  { %v1074_v23 = vpop.eup %1073 }
 0x521   :  { %v615_v24 = vmul.f32 0.5, %v1074_v23 }
 0x523   :  { %v616_v25 = vadd.f32 0.5, %v615_v24 }
 0x525   :  { %v617_v26 = vmul.f32 %v616_v25, %v610_v20 }
 0x527   :  { %1056 = vmatmul.mubr.f32.vlgmr.msra.gmra.mxu0 %v617_v26 }
 0x5e7   :  { %v709_v27 = vpop.f32.mrf.mxu0 }
 0x5e8   :  { %v710_v28 = vadd.f32 %v738_v0, %v709_v27 }
 0x5e9   :  { %v1057_v29 = vpop.f32.mrf.mxu0 }
 0x5ea   :  { %v713_v30 = vmul.f32 0.5, %v710_v28 }
 0x5ec   :  { %1075 = vtanh.f32 %v713_v30 }
 0x5f9   :  { %v1076_v31 = vpop.eup %1075 }
 0x5fa   :  { %v715_v32 = vmul.f32 0.5, %v1076_v31 }
 0x5fc   :  { %v716_v33 = vadd.f32 0.5, %v715_v32 }
 0x5fe   :  { %v717_v34 = vmul.f32 %v716_v33, %v710_v28 }
 0x600   :  { %719 = vst.msk [vmem:[%s1277_s4] sm:$0xff] %vm718_vm2, %v717_v34 }
 0x601   :  { %724 = vsyncpa [#allocation3], 1 }

</bundles_post_ra>
